<compile_context>
chip_gen: v5e
topology: v5e:2x2
jax: 0.10.0
libtpu: 0.0.40
codegen_flags: <defaults>
</compile_context>

<pallas_src>
import jax
import jax.numpy as jnp
from jax.experimental import pallas as pl
from jax.experimental.pallas import tpu as pltpu


def _round_up(x, n):
    return ((x + n - 1) // n) * n


def _edge_loss_kernel(ep_ref, et_ref, a_ref, out_ref, acc_ref):
    """Accumulate the edge loss of one (tm, tn) tile.

    Grid = (row tiles [parallel], column tiles [arbitrary]).  The VMEM
    accumulator is reset at the first column tile of each row tile and folded
    to a lane-dense (8, 128) partial written to the output at the last one.
    """
    j = pl.program_id(1)
    nj = pl.num_programs(1)

    @pl.when(j == 0)
    def _init():
        acc_ref[...] = jnp.zeros_like(acc_ref)

    # Upcast: A / Epsilon_true may arrive in bf16 (values exact) to halve HBM bytes.
    ep = ep_ref[...].astype(jnp.float32)
    et = et_ref[...].astype(jnp.float32)
    a = a_ref[...].astype(jnp.float32)

    edge = jnp.maximum((1.0 - 2.0 * a - 2.0 * et) * ep + jnp.abs(et), 0.0)
    acc_ref[...] += edge * edge

    @pl.when(j == nj - 1)
    def _finalize():
        acc = acc_ref[...]
        tm, tn = acc.shape
        # Fold sublane-aligned row blocks down to 8 rows (cheap vreg adds) ...
        part = acc[0:8, :]
        for rb in range(1, tm // 8):
            part = part + acc[rb * 8:(rb + 1) * 8, :]
        # ... then lane-aligned column blocks down to 128 lanes.
        folded = part[:, 0:128]
        for cb in range(1, tn // 128):
            folded = folded + part[:, cb * 128:(cb + 1) * 128]
        out_ref[...] = folded


def _edge_loss_partials(Epsilon_pred, Epsilon_true, A, *, tm=256, tn=1024,
                        vmem_limit_bytes=32 * 1024 * 1024):
    m = Epsilon_pred.shape[0]
    # Pad rows to a multiple of 8 and columns to a multiple of 128 (zero padding
    # contributes exactly 0 to the loss), then pick tile sizes that divide the
    # padded shape while staying close to the requested (tm, tn) budget.
    mp = _round_up(m, 8)
    np_ = _round_up(m, 128)
    gi = pl.cdiv(mp, tm)
    gj = pl.cdiv(np_, tn)
    tm_eff = _round_up(pl.cdiv(mp, gi), 8)
    tn_eff = _round_up(pl.cdiv(np_, gj), 128)
    mp = gi * tm_eff
    np_ = gj * tn_eff

    def pad(x):
        # When m is already aligned the pad widths are zero and XLA elides it.
        return jnp.pad(x, ((0, mp - m), (0, np_ - m)))

    ep = pad(Epsilon_pred)
    et = pad(Epsilon_true)
    a = pad(A)

    edge_spec = pl.BlockSpec((tm_eff, tn_eff), lambda i, j: (i, j))

    partials = pl.pallas_call(
        _edge_loss_kernel,
        out_shape=jax.ShapeDtypeStruct((gi * 8, 128), jnp.float32),
        grid_spec=pltpu.PrefetchScalarGridSpec(
            num_scalar_prefetch=0,
            grid=(gi, gj),
            in_specs=[edge_spec, edge_spec, edge_spec],
            out_specs=pl.BlockSpec((8, 128), lambda i, j: (i, 0)),
            scratch_shapes=[pltpu.VMEM((tm_eff, tn_eff), jnp.float32)],
        ),
        compiler_params=pltpu.CompilerParams(
            dimension_semantics=("parallel", "arbitrary"),
            vmem_limit_bytes=vmem_limit_bytes,
        ),
    )(ep, et, a)
    return partials


def gen_loss(delta_pred, Epsilon_pred, delta_true, Epsilon_true, A, *,
             tm=256, tn=1024):
    """Pallas implementation of GEN_loss.forward (edge_filters=None path)."""
    # --- node loss: O(m) on (m, 1) data -> plain JAX (no kernel DMAs needed) ---
    dp = delta_pred.astype(jnp.float32)
    dt = delta_true.astype(jnp.float32)
    relu = lambda x: jnp.maximum(x, 0.0)
    node = jnp.where(dt < -0.5, relu(dp + 1.0) ** 2, 0.0)
    zmask = (dt >= -0.5) & (dt <= 0.5)
    node = node + jnp.where(zmask, relu(dp - 0.25) ** 2 + relu(-dp - 0.25) ** 2, 0.0)
    node = node + jnp.where(dt > 0.5, relu(-dp + 1.0) ** 2, 0.0)
    node_loss = jnp.sum(node)

    # --- edge loss: O(m^2), Pallas kernel ---
    partials = _edge_loss_partials(Epsilon_pred, Epsilon_true, A, tm=tm, tn=tn)
    edge_loss = jnp.sum(partials)
    return node_loss + edge_loss


def gen_loss_ref(delta_pred, Epsilon_pred, delta_true, Epsilon_true, A):
    """Pure-JAX reference matching the PyTorch semantics."""
    relu = lambda x: jnp.maximum(x, 0.0)
    dt = delta_true
    dp = delta_pred
    node = jnp.where(dt < -0.5, relu(dp + 1.0) ** 2, 0.0)
    zmask = (dt >= -0.5) & (dt <= 0.5)
    node = node + jnp.where(zmask, relu(dp - 0.25) ** 2 + relu(-dp - 0.25) ** 2, 0.0)
    node = node + jnp.where(dt > 0.5, relu(-dp + 1.0) ** 2, 0.0)
    node_loss = jnp.sum(node)
    edge_loss = jnp.sum(
        relu((1.0 - 2.0 * A - 2.0 * Epsilon_true) * Epsilon_pred
             + jnp.abs(Epsilon_true)) ** 2)
    return node_loss + edge_loss


if __name__ == "__main__":
    # m = 16: tiny aligned case.  m = 200: exercises row/column zero-padding.
    for m in (16, 200):
        key = jax.random.PRNGKey(0)
        k1, k2, k3, k4, k5 = jax.random.split(key, 5)

        delta_pred = jax.random.normal(k1, (m, 1), dtype=jnp.float32)
        Epsilon_pred = jax.random.normal(k2, (m, m), dtype=jnp.float32)
        # ground-truth node edits in {-1, 0, +1}
        delta_true = jax.random.randint(k3, (m, 1), -1, 2).astype(jnp.float32)
        # adjacency in {0, 1}
        A = jax.random.randint(k4, (m, m), 0, 2).astype(jnp.float32)
        # edge edits: +1 where edge can be added (A==0), -1 where it can be deleted
        edit_mask = (jax.random.uniform(k5, (m, m)) < 0.3).astype(jnp.float32)
        Epsilon_true = edit_mask * (1.0 - 2.0 * A)

        # A in {0,1} and Epsilon_true in {-1,0,1} are exactly representable in
        # bf16 -> pass them narrow to halve their HBM traffic (kernel upcasts).
        loss = gen_loss(delta_pred, Epsilon_pred, delta_true,
                        Epsilon_true.astype(jnp.bfloat16),
                        A.astype(jnp.bfloat16))
        loss = jax.block_until_ready(loss)

        ref = gen_loss_ref(delta_pred, Epsilon_pred, delta_true, Epsilon_true, A)
        assert jnp.allclose(loss, ref, rtol=1e-4, atol=1e-4), (m, loss, ref)

    print("KERNEL_OK")
</pallas_src>

<mosaic_0001>
module attributes {stable_mosaic.version = 11 : i64} {
  func.func @_edge_loss_kernel(%arg0: i32, %arg1: i32, %arg2: memref<16x128xf32, #tpu.memory_space<vmem>>, %arg3: memref<16x128xbf16, #tpu.memory_space<vmem>>, %arg4: memref<16x128xbf16, #tpu.memory_space<vmem>>, %arg5: memref<8x128xf32, #tpu.memory_space<vmem>>, %arg6: memref<16x128xf32, #tpu.memory_space<vmem>>) attributes {dimension_semantics = [#tpu.dimension_semantics<parallel>, #tpu.dimension_semantics<arbitrary>], iteration_bounds = array<i64: 1, 1>, scalar_prefetch = 0 : i64, scratch_operands = 1 : i64, tpu.core_type = #tpu.core_type<tc>, window_params = [{transform_indices = @transform_0, window_bounds = array<i64: 16, 128>}, {transform_indices = @transform_1, window_bounds = array<i64: 16, 128>}, {transform_indices = @transform_2, window_bounds = array<i64: 16, 128>}, {transform_indices = @transform_3, window_bounds = array<i64: 8, 128>}]} {
    %c0_i32 = arith.constant 0 : i32
    %0 = arith.cmpi eq, %arg1, %c0_i32 : i32
    %1 = arith.extui %0 : i1 to i32
    %c0_i32_0 = arith.constant 0 : i32
    %2 = arith.cmpi ne, %1, %c0_i32_0 : i32
    scf.if %2 {
      %cst_15 = arith.constant 0.000000e+00 : f32
      %27 = vector.broadcast %cst_15 : f32 to vector<16x128xf32>
      %c0_16 = arith.constant 0 : index
      %c0_17 = arith.constant 0 : index
      %28 = vector.load %arg6[%c0_16, %c0_17] : memref<16x128xf32, #tpu.memory_space<vmem>>, vector<16x128xf32>
      tpu.vector_store %arg6[%c0_16, %c0_17], %27 {strides = array<i32>} : memref<16x128xf32, #tpu.memory_space<vmem>>, vector<16x128xf32>,
    } else {
    }
    %c0 = arith.constant 0 : index
    %c0_1 = arith.constant 0 : index
    %3 = vector.load %arg2[%c0, %c0_1] : memref<16x128xf32, #tpu.memory_space<vmem>>, vector<16x128xf32>
    %c0_2 = arith.constant 0 : index
    %c0_3 = arith.constant 0 : index
    %4 = vector.load %arg3[%c0_2, %c0_3] : memref<16x128xbf16, #tpu.memory_space<vmem>>, vector<16x128xbf16>
    %5 = arith.extf %4 : vector<16x128xbf16> to vector<16x128xf32>
    %c0_4 = arith.constant 0 : index
    %c0_5 = arith.constant 0 : index
    %6 = vector.load %arg4[%c0_4, %c0_5] : memref<16x128xbf16, #tpu.memory_space<vmem>>, vector<16x128xbf16>
    %7 = arith.extf %6 : vector<16x128xbf16> to vector<16x128xf32>
    %cst = arith.constant 2.000000e+00 : f32
    %8 = vector.broadcast %cst : f32 to vector<16x128xf32>
    %9 = arith.mulf %8, %7 : vector<16x128xf32>
    %cst_6 = arith.constant 1.000000e+00 : f32
    %10 = vector.broadcast %cst_6 : f32 to vector<16x128xf32>
    %11 = arith.subf %10, %9 : vector<16x128xf32>
    %cst_7 = arith.constant 2.000000e+00 : f32
    %12 = vector.broadcast %cst_7 : f32 to vector<16x128xf32>
    %13 = arith.mulf %12, %5 : vector<16x128xf32>
    %14 = arith.subf %11, %13 : vector<16x128xf32>
    %15 = arith.mulf %14, %3 : vector<16x128xf32>
    %16 = math.absf %5 : vector<16x128xf32>
    %17 = arith.addf %15, %16 : vector<16x128xf32>
    %cst_8 = arith.constant 0.000000e+00 : f32
    %18 = vector.broadcast %cst_8 : f32 to vector<16x128xf32>
    %19 = arith.maximumf %17, %18 : vector<16x128xf32>
    %c0_9 = arith.constant 0 : index
    %c0_10 = arith.constant 0 : index
    %20 = vector.load %arg6[%c0_9, %c0_10] : memref<16x128xf32, #tpu.memory_space<vmem>>, vector<16x128xf32>
    %21 = arith.mulf %19, %19 : vector<16x128xf32>
    %22 = arith.addf %20, %21 : vector<16x128xf32>
    %c0_11 = arith.constant 0 : index
    %c0_12 = arith.constant 0 : index
    %23 = vector.load %arg6[%c0_11, %c0_12] : memref<16x128xf32, #tpu.memory_space<vmem>>, vector<16x128xf32>
    tpu.vector_store %arg6[%c0_11, %c0_12], %22 {strides = array<i32>} : memref<16x128xf32, #tpu.memory_space<vmem>>, vector<16x128xf32>,
    %c0_i32_13 = arith.constant 0 : i32
    %24 = arith.cmpi eq, %arg1, %c0_i32_13 : i32
    %25 = arith.extui %24 : i1 to i32
    %c0_i32_14 = arith.constant 0 : i32
    %26 = arith.cmpi ne, %25, %c0_i32_14 : i32
    scf.if %26 {
      %c0_15 = arith.constant 0 : index
      %c0_16 = arith.constant 0 : index
      %27 = vector.load %arg6[%c0_15, %c0_16] : memref<16x128xf32, #tpu.memory_space<vmem>>, vector<16x128xf32>
      %28 = vector.extract_strided_slice %27 {offsets = [0, 0], sizes = [8, 128], strides = [1, 1]} : vector<16x128xf32> to vector<8x128xf32>
      %29 = vector.extract_strided_slice %27 {offsets = [8, 0], sizes = [8, 128], strides = [1, 1]} : vector<16x128xf32> to vector<8x128xf32>
      %30 = arith.addf %28, %29 : vector<8x128xf32>
      %c0_17 = arith.constant 0 : index
      %c0_18 = arith.constant 0 : index
      %31 = vector.load %arg5[%c0_17, %c0_18] : memref<8x128xf32, #tpu.memory_space<vmem>>, vector<8x128xf32>
      tpu.vector_store %arg5[%c0_17, %c0_18], %30 {strides = array<i32>} : memref<8x128xf32, #tpu.memory_space<vmem>>, vector<8x128xf32>,
    } else {
    }
    return
  }
  func.func @transform_0(%arg0: i32, %arg1: i32) -> (i32, i32) {
    %c0_i32 = arith.constant 0 : i32
    return %arg0, %arg1 : i32, i32
  }
  func.func @transform_1(%arg0: i32, %arg1: i32) -> (i32, i32) {
    %c0_i32 = arith.constant 0 : i32
    return %arg0, %arg1 : i32, i32
  }
  func.func @transform_2(%arg0: i32, %arg1: i32) -> (i32, i32) {
    %c0_i32 = arith.constant 0 : i32
    return %arg0, %arg1 : i32, i32
  }
  func.func @transform_3(%arg0: i32, %arg1: i32) -> (i32, i32) {
    %c0_i32 = arith.constant 0 : i32
    %c0_i32_0 = arith.constant 0 : i32
    return %arg0, %c0_i32 : i32, i32
  }
}

</mosaic_0001>

<bundles_post_ra>
// kernel: tpu_custom_call.1
= control target key start
LH: loop header
LB: loop body
LE: loop exit
PB: predicated region body
PF: predicated region fallthrough
CT: control target
= control target key end

     0   :  { %8 = vsyncpa [#allocation4], 0  ;;  %s285_s0 = inlined_call_operand.hbm [shape: f32[16,128], index: 0, kind: input, shape index: {}]   ;;  %s286_s1 = inlined_call_operand.hbm [shape: bf16[16,128], index: 1, kind: input, shape index: {}]   ;;  %s287_s2 = inlined_call_operand.hbm [shape: bf16[16,128], index: 2, kind: input, shape index: {}]   ;;  %s288_s3 = inlined_call_operand.hbm [shape: f32[8,128], index: 3, kind: output, shape index: {}]  }
   0x1   :  { %9 = vsyncpa [#allocation7], 0  ;;  %s28_s14 = sshll.u32 %s286_s1, 4  ;;  %s29_s14 = int_to_ptr.hbm [resolvable:$true] %s28_s14 }
   0x2   :  { %10 = vsyncpa [#allocation5], 0  ;;  %s245_s15 = smov [#allocation6]   ;;  %s15_s19 = sshll.u32 %s285_s0, 4  ;;  %s16_s19 = int_to_ptr.hbm [resolvable:$true] %s15_s19 }
   0x3   :  { %s30_s16 = sshll.u32 %s245_s15, 4  ;;  %s246_s20 = smov 64   ;;  %s31_s16 = int_to_ptr.vmem [resolvable:$true] %s30_s16 }
   0x4   :  { %s247_s21 = smov 4   ;;  %s248_s22 = smov [#allocation3]  }
   0x5   :  { %36 = dma.hbm_to_vmem [thread:$0]  %s29_s14, 128, %s31_s16, [#allocation7], %s246_s20, %s246_s20, %s247_s21  }
   0x6   :  { %s17_s23 = sshll.u32 %s248_s22, 4  ;;  %s249_s24 = smov 128   ;;  %s18_s23 = int_to_ptr.vmem [resolvable:$true] %s17_s23 }
   0x7   :  { %s250_s25 = smov 8   ;;  %s41_s27 = sshll.u32 %s287_s2, 4  ;;  %s42_s27 = int_to_ptr.hbm [resolvable:$true] %s41_s27 }
   0x8   :  { %23 = dma.hbm_to_vmem [thread:$0]  %s16_s19, 256, %s18_s23, [#allocation4], %s249_s24, %s249_s24, %s250_s25  }
   0x9   :  { %s251_s28 = smov [#allocation8]  }
   0xa   :  { %s43_s29 = sshll.u32 %s251_s28, 4  ;;  %s44_s29 = int_to_ptr.vmem [resolvable:$true] %s43_s29 }
   0xb   :  { %49 = dma.hbm_to_vmem [thread:$0]  %s42_s27, 128, %s44_s29, [#allocation7], %s246_s20, %s246_s20, %s247_s21  }
   0xc   :  { %239 = dma.done.wait [#allocation4], 256  }
   0xd   :  { %240 = vsyncadd [#allocation4], 4294967040 }
   0xe   :  { %241 = dma.done.wait [#allocation7], 256  }
   0xf   :  { %242 = vsyncadd [#allocation7], 4294967040  ;;  %v128_v0 = vld [vmem:[#allocation6] sm:$0xff]   ;;  %v132_v3 = vld [vmem:[#allocation8] sm:$0xff]   ;;  %s252_s0 = smov [#allocation9]   ;;  %s116_s5 = sshll.u32 %s288_s3, 4  ;;  %s117_s5 = int_to_ptr.hbm [resolvable:$true] %s116_s5 }
  0x10   :  { %v129_v1 = vunpack.c.l.bf16 %v128_v0  ;;  %v130_v2 = vunpack.c.h.bf16 %v128_v0  ;;  %v133_v4 = vunpack.c.l.bf16 %v132_v3  ;;  %v134_v5 = vunpack.c.h.bf16 %v132_v3  ;;  %v68_v12 = vld [vmem:[#allocation3] sm:$0xff]  ;;  %v69_v13 = vld [vmem:[#allocation3 + $0x8] sm:$0xff]  ;;  %s114_s2 = sshll.u32 %s252_s0, 4  ;;  %s115_s2 = int_to_ptr.vmem [resolvable:$true] %s114_s2 }
  0x12   :  { %v78_v6 = vmul.f32 2.0, %v133_v4  ;;  %v79_v7 = vmul.f32 2.0, %v134_v5  ;;  %v82_v8 = vmul.f32 2.0, %v129_v1  ;;  %v83_v9 = vmul.f32 2.0, %v130_v2 }
  0x13   :  { %v88_v16 = vand.u32 2147483647, %v129_v1  ;;  %v89_v17 = vand.u32 2147483647, %v130_v2 }
  0x14   :  { %v80_v10 = vsub.f32 1.0, %v78_v6  ;;  %v81_v11 = vsub.f32 1.0, %v79_v7 }
  0x16   :  { %v84_v14 = vsub.f32 %v80_v10, %v82_v8  ;;  %v85_v15 = vsub.f32 %v81_v11, %v83_v9 }
  0x18   :  { %v86_v18 = vmul.f32 %v84_v14, %v68_v12  ;;  %v87_v19 = vmul.f32 %v85_v15, %v69_v13 }
  0x1a   :  { %v90_v20 = vadd.f32 %v88_v16, %v86_v18  ;;  %v91_v21 = vadd.f32 %v89_v17, %v87_v19 }
  0x1c   :  { %v92_v22 = vmax.f32 %v90_v20, 0.0  ;;  %v93_v23 = vmax.f32 %v91_v21, 0.0 }
  0x1e   :  { %v96_v24 = vmul.f32 %v92_v22, %v92_v22  ;;  %v97_v25 = vmul.f32 %v93_v23, %v93_v23 }
  0x20   :  { %v107_v26 = vadd.f32 %v97_v25, %v96_v24 }
  0x22   :  { %108 = vst [vmem:[#allocation9] sm:$0xff] %v107_v26 }
  0x23   :  { %119 = dma.vmem_to_hbm [thread:$0]  %s115_s2, 128, %s117_s5, [#allocation5]  }
  0x24   :  { %243 = dma.done.wait [#allocation5], 128  }
  0x25   :  { %244 = vsyncadd [#allocation5], 4294967168 }
  0x26   :  { %124 = vsyncpa [#allocation4], 1 }
  0x27   :  { %125 = vsyncpa [#allocation7], 1 }
  0x28   :  { %126 = vsyncpa [#allocation5], 1 }

</bundles_post_ra>
